<compile_context>
chip_gen: v5e
topology: v5e:2x2
jax: 0.10.0
libtpu: 0.0.40
codegen_flags: <defaults>
</compile_context>

<pallas_src>
import functools
import math

import jax
import jax.numpy as jnp
from jax import lax
from jax.experimental import pallas as pl
from jax.experimental.pallas import tpu as pltpu


# ----------------------------- helpers (traced inside kernels) ----------------

_GELU_INV = 1.0 / 1.41421   # reference uses x / 1.41421; multiply by reciprocal


def _gelu(x):
    return x * 0.5 * (1.0 + lax.erf(x * _GELU_INV))


def _layernorm(x, gamma, beta, eps=1e-12):
    u = jnp.mean(x, axis=-1, keepdims=True)
    xc = x - u
    s = jnp.mean(xc * xc, axis=-1, keepdims=True)
    return gamma * (xc * lax.rsqrt(s + eps)) + beta


def _split_heads(x2d, nh, hd):
    # [rows, nh*hd] -> [nh, rows, hd]  (static lane slices + leading-dim stack)
    return jnp.stack([x2d[:, h * hd:(h + 1) * hd] for h in range(nh)], axis=0)


def _merge_heads(x3d, nh):
    # [nh, rows, hd] -> [rows, nh*hd]  (lane concat, head-major like torch .view)
    return jnp.concatenate([x3d[h] for h in range(nh)], axis=-1)


# ----------------------------- tuning knobs ------------------------------------

def _vmem_capacity_bytes():
    try:
        return int(pltpu.get_tpu_info().vmem_capacity_bytes)
    except Exception:
        return 64 * 1024 * 1024


_VMEM_CAP = _vmem_capacity_bytes()
_VMEM_LIMIT = int(_VMEM_CAP * 0.75)


def _probe_single_buffer():
    # Grid-invariant weights only need ONE VMEM buffer; probe whether this JAX
    # version accepts pipeline_mode=pl.Buffered(1) and fall back cleanly if not.
    try:
        mode = pl.Buffered(1)

        def k(x_ref, o_ref):
            o_ref[...] = x_ref[...] + 0.0

        y = pl.pallas_call(
            k,
            out_shape=jax.ShapeDtypeStruct((8, 128), jnp.float32),
            grid=(1,),
            in_specs=[pl.BlockSpec((8, 128), lambda i: (0, 0),
                                   pipeline_mode=mode)],
            out_specs=pl.BlockSpec((8, 128), lambda i: (0, 0)),
        )(jnp.zeros((8, 128), jnp.float32))
        jax.block_until_ready(y)
        return mode
    except Exception:
        return None


_WEIGHT_PIPELINE_MODE = _probe_single_buffer()
_WEIGHT_BUFS = 1 if _WEIGHT_PIPELINE_MODE is not None else 2


def _const_spec(shape):
    """BlockSpec for a grid-invariant (broadcast) operand, single-buffered if possible."""
    nd = len(shape)
    if _WEIGHT_PIPELINE_MODE is not None:
        return pl.BlockSpec(shape, lambda *_: (0,) * nd,
                            pipeline_mode=_WEIGHT_PIPELINE_MODE)
    return pl.BlockSpec(shape, lambda *_: (0,) * nd)


def _pick_tile(n, candidates):
    for t in candidates:
        if n >= t and n % t == 0:
            return t
    return n


def _block_step_bytes(S, tq, H, nh, weight_bufs):
    """Rough per-grid-step VMEM footprint (bytes) of the fused block kernel."""
    Hi = 4 * H
    BF, F32 = 2, 4
    n_tiles = S // tq
    weights = (H * 3 * H + H * H + H * Hi + Hi * H) * BF * weight_bufs
    weights += (3 * H + H + Hi + H + 4 * H) * F32 * weight_bufs        # biases + LN params
    io = 2 * S * H * BF + 2 * tq * H * BF + 2 * S * F32                # x, out (double-buffered), mask
    kv_scratch = 3 * S * H * BF if n_tiles > 1 else 0                  # q/k/v cache
    inter = S * 3 * H * (F32 + BF)                                     # fused qkv (+ bf16 copy)
    inter += nh * tq * S * (2 * F32 + BF)                              # scores, probs, probs bf16
    inter += 2 * tq * H * (F32 + BF)                                   # ctx / merged ctx
    inter += 3 * tq * H * F32                                          # attn, h1, ff_out
    inter += tq * Hi * (F32 + BF)                                      # FFN intermediate
    return weights + io + kv_scratch + inter


def _choose_tq(S, H, nh):
    """Largest query tile whose estimated footprint fits the VMEM budget."""
    budget = int(_VMEM_LIMIT * 0.9)
    if _block_step_bytes(S, S, H, nh, _WEIGHT_BUFS) <= budget:
        return S                                      # single tile, no KV scratch
    divisors = [t for t in (512, 256, 128) if t < S and S % t == 0]
    for t in divisors:
        if _block_step_bytes(S, t, H, nh, _WEIGHT_BUFS) <= budget:
            return t
    return divisors[-1] if divisors else S


# ----------------------------- Pallas kernels ----------------------------------

def embed_ln_kernel(x_ref, g_ref, b_ref, o_ref):
    # x: [rows, E] f32 tile, g/b: [1, E]; output streamed as bf16.
    o_ref[...] = _layernorm(x_ref[...], g_ref[...], b_ref[...]).astype(o_ref.dtype)


def block_kernel(x_ref, mask_ref,
                 wqkv_ref, bqkv_ref, wo_ref, bo_ref, g1_ref, be1_ref,
                 w1_ref, b1_ref, w2_ref, b2_ref, g2_ref, be2_ref,
                 o_ref, *scratch, num_heads, tile_q, num_tiles):
    f32, bf16 = jnp.float32, jnp.bfloat16
    S, H = x_ref.shape            # full-sequence rows (bf16)
    nh = num_heads
    hd = H // nh
    TQ = tile_q

    def project_qkv(x_bf):
        # ONE fused [rows, H] x [H, 3H] matmul; 1/sqrt(hd) already folded into Q.
        qkv = jnp.dot(x_bf, wqkv_ref[...],
                      preferred_element_type=f32) + bqkv_ref[...]
        qkv = qkv.astype(bf16)
        q = _split_heads(qkv[:, :H], nh, hd)          # [nh, rows, hd]
        k = _split_heads(qkv[:, H:2 * H], nh, hd)
        v = _split_heads(qkv[:, 2 * H:], nh, hd)
        return q, k, v

    if num_tiles == 1:
        xq_bf = x_ref[...]                            # [S, H] bf16 (TQ == S)
        q, k, v = project_qkv(xq_bf)
    else:
        q_scr, k_scr, v_scr = scratch
        t = pl.program_id(1)

        # Compute Q/K/V once per batch element, reuse across query tiles.
        @pl.when(t == 0)
        def _():
            qs, ks, vs = project_qkv(x_ref[...])
            q_scr[...] = qs
            k_scr[...] = ks
            v_scr[...] = vs

        row0 = pl.multiple_of(t * TQ, TQ)
        xq_bf = x_ref[pl.ds(row0, TQ), :]             # [TQ, H] bf16 residual rows
        q = q_scr[:, pl.ds(row0, TQ), :]              # [nh, TQ, hd] bf16
        k = k_scr[...]
        v = v_scr[...]

    xq = xq_bf.astype(f32)
    mask = mask_ref[...]                              # [1, S] f32 additive mask

    # Scores (scale pre-folded into Q) + masked, numerically-stable softmax.
    s = jnp.einsum("hqd,hkd->hqk", q, k,
                   preferred_element_type=f32) + mask[None, :, :]
    s = s - jnp.max(s, axis=-1, keepdims=True)
    p = jnp.exp(s)
    p = p * pl.reciprocal(jnp.sum(p, axis=-1, keepdims=True), approx=True)

    ctx = jnp.einsum("hqk,hkd->hqd", p.astype(bf16), v,
                     preferred_element_type=f32)      # [nh, TQ, hd]
    ctx2d = _merge_heads(ctx.astype(bf16), nh)        # [TQ, H] (head-major lanes)

    # Single lane-dense output projection.
    attn = jnp.dot(ctx2d, wo_ref[...],
                   preferred_element_type=f32) + bo_ref[...]
    h1 = _layernorm(attn + xq, g1_ref[...], be1_ref[...])

    ff = _gelu(jnp.dot(h1.astype(bf16), w1_ref[...],
                       preferred_element_type=f32) + b1_ref[...])
    ff_out = jnp.dot(ff.astype(bf16), w2_ref[...],
                     preferred_element_type=f32) + b2_ref[...]
    o_ref[...] = _layernorm(ff_out + h1, g2_ref[...], be2_ref[...]).astype(o_ref.dtype)


def head_kernel(x_ref, wd_ref, bd_ref, wp_ref, bp_ref, o_ref):
    # x: [TS, H] bf16 rows, wd: [H, H] bf16, wp: [1, H] bf16.
    f32, bf16 = jnp.float32, jnp.bfloat16
    h = jnp.dot(x_ref[...], wd_ref[...],
                preferred_element_type=f32) + bd_ref[...]
    h = _gelu(h)
    # [1,H] x [TS,H]^T -> lane-dense [1, TS] row (avoids an N=1 matmul and a
    # lane-width-1 masked store).
    scores = lax.dot_general(wp_ref[...], h.astype(bf16),
                             dimension_numbers=(((1,), (1,)), ((), ())),
                             preferred_element_type=f32)
    o_ref[...] = scores + bp_ref[...]


# ----------------------------- wrappers -----------------------------------------

def run_block(x, mask_add, lp, cfg, tq):
    B, S, H = x.shape
    nh = cfg["num_heads"]
    hd = H // nh
    Hi = 4 * H
    n_tiles = S // tq

    kernel = functools.partial(block_kernel, num_heads=nh, tile_q=tq,
                               num_tiles=n_tiles)

    in_specs = [
        pl.BlockSpec((None, S, H), lambda b, t: (b, 0, 0)),    # x: Q rows + K/V rows (single input)
        pl.BlockSpec((None, 1, S), lambda b, t: (b, 0, 0)),    # additive attention mask
        _const_spec((H, 3 * H)), _const_spec((1, 3 * H)),      # fused QKV weight/bias (Q pre-scaled)
        _const_spec((H, H)), _const_spec((1, H)),              # out proj
        _const_spec((1, H)), _const_spec((1, H)),              # attn LN gamma, beta
        _const_spec((H, Hi)), _const_spec((1, Hi)),            # fc1 weight, bias
        _const_spec((Hi, H)), _const_spec((1, H)),             # fc2 weight, bias
        _const_spec((1, H)), _const_spec((1, H)),              # ffn LN gamma, beta
    ]
    scratch = ()
    if n_tiles > 1:
        scratch = (pltpu.VMEM((nh, S, hd), jnp.bfloat16),      # Q cache
                   pltpu.VMEM((nh, S, hd), jnp.bfloat16),      # K cache
                   pltpu.VMEM((nh, S, hd), jnp.bfloat16))      # V cache

    return pl.pallas_call(
        kernel,
        out_shape=jax.ShapeDtypeStruct((B, S, H), jnp.bfloat16),
        grid=(B, n_tiles),
        in_specs=in_specs,
        out_specs=pl.BlockSpec((None, tq, H), lambda b, t: (b, t, 0)),
        scratch_shapes=scratch,
        compiler_params=pltpu.CompilerParams(
            dimension_semantics=("parallel", "arbitrary"),
            vmem_limit_bytes=_VMEM_LIMIT),
    )(x, mask_add,
      lp["wqkv"], lp["bqkv"], lp["wo"], lp["bo"], lp["ln1_g"], lp["ln1_b"],
      lp["w1"], lp["b1"], lp["w2"], lp["b2"], lp["ln2_g"], lp["ln2_b"])


def electra_discriminator_forward(fp, input_ids, token_type_ids, attention_mask, cfg):
    B, S = input_ids.shape
    E = cfg["embedding_size"]
    H = cfg["hidden_size"]

    # ---- Embeddings (gathers in plain JAX; LayerNorm row-tiled in Pallas) ----
    pos_ids = jnp.arange(S, dtype=jnp.int32)
    emb = (fp["w_word"][input_ids]
           + fp["w_pos"][pos_ids][None, :, :]
           + fp["w_tok"][token_type_ids])

    BS = B * S
    TR = _pick_tile(BS, (1024, 512, 256))
    emb_ln = pl.pallas_call(
        embed_ln_kernel,
        out_shape=jax.ShapeDtypeStruct((BS, E), jnp.bfloat16),
        grid=(BS // TR,),
        in_specs=[pl.BlockSpec((TR, E), lambda i: (i, 0)),
                  _const_spec((1, E)), _const_spec((1, E))],
        out_specs=pl.BlockSpec((TR, E), lambda i: (i, 0)),
        compiler_params=pltpu.CompilerParams(
            dimension_semantics=("parallel",), vmem_limit_bytes=_VMEM_LIMIT),
    )(emb.reshape(BS, E), fp["emb_ln_g"], fp["emb_ln_b"])
    x = emb_ln.reshape(B, S, H)   # embedding_size == hidden_size -> no projection
    # dropout == identity (inference)

    # ---- extended attention mask: (1 - mask) * -10000
    mask_add = ((1.0 - attention_mask.astype(jnp.float32)) * -10000.0).reshape(B, 1, S)

    # ---- Encoder: one fused Pallas kernel per Block (bf16 activations in HBM) ----
    tq = _choose_tq(S, H, cfg["num_heads"])
    for lp in fp["layers"]:
        x = run_block(x, mask_add, lp, cfg, tq)

    # ---- Prediction head: lane-dense [1, TS] rows, tiled over (batch, seq) ----
    TS = _pick_tile(S, (1024, 512, 256, 128))
    scores = pl.pallas_call(
        head_kernel,
        out_shape=jax.ShapeDtypeStruct((B, 1, S), jnp.float32),
        grid=(B, S // TS),
        in_specs=[pl.BlockSpec((None, TS, H), lambda b, s: (b, s, 0)),
                  _const_spec((H, H)), _const_spec((1, H)),
                  _const_spec((1, H)), _const_spec((1, 1))],
        out_specs=pl.BlockSpec((None, 1, TS), lambda b, s: (b, 0, s)),
        compiler_params=pltpu.CompilerParams(
            dimension_semantics=("parallel", "parallel"),
            vmem_limit_bytes=_VMEM_LIMIT),
    )(x, fp["head_wd"], fp["head_bd"], fp["head_wp"], fp["head_bp"])
    return scores.reshape(B, S)   # .squeeze(-1) semantics


# ----------------------------- parameters ---------------------------------------

def init_params(key, cfg):
    """Parameters in PyTorch-like layout (Linear weights are [out, in])."""
    H = cfg["hidden_size"]
    E = cfg["embedding_size"]
    Hi = 4 * H
    keys = iter(jax.random.split(key, 256))

    def nrm(shape):
        return (0.02 * jax.random.normal(next(keys), shape)).astype(jnp.float32)

    p = {}
    p["w_word"] = nrm((cfg["vocab_size"], E)).at[0].set(0.0)   # padding_idx=0
    p["w_pos"] = nrm((cfg["max_position_embeddings"], E))
    p["w_tok"] = nrm((cfg["type_vocab_size"], E))
    p["emb_ln_g"] = jnp.ones((1, E), jnp.float32)
    p["emb_ln_b"] = jnp.zeros((1, E), jnp.float32)

    layers = []
    for _ in range(cfg["num_hidden_layers"]):
        layers.append(dict(
            wq=nrm((H, H)), bq=jnp.zeros((1, H), jnp.float32),
            wk=nrm((H, H)), bk=jnp.zeros((1, H), jnp.float32),
            wv=nrm((H, H)), bv=jnp.zeros((1, H), jnp.float32),
            wo=nrm((H, H)), bo=jnp.zeros((1, H), jnp.float32),
            ln1_g=jnp.ones((1, H), jnp.float32), ln1_b=jnp.zeros((1, H), jnp.float32),
            w1=nrm((Hi, H)), b1=nrm((1, Hi)),          # LinearActivation (bias_gelu)
            w2=nrm((H, Hi)), b2=jnp.zeros((1, H), jnp.float32),
            ln2_g=jnp.ones((1, H), jnp.float32), ln2_b=jnp.zeros((1, H), jnp.float32),
        ))
    p["layers"] = layers

    p["head_wd"] = nrm((H, H))
    p["head_bd"] = nrm((1, H))
    p["head_wp"] = nrm((1, H))                          # Linear(hidden, 1) weight
    p["head_bp"] = jnp.zeros((1, 1), jnp.float32)
    return p


def prepare_params(p, cfg):
    """One-time layout prep: transpose, fuse QKV, fold the score scale, cast to bf16."""
    H = cfg["hidden_size"]
    nh = cfg["num_heads"]
    hd = H // nh
    bf16 = jnp.bfloat16
    scale = 1.0 / math.sqrt(hd)

    fp = {
        "w_word": p["w_word"], "w_pos": p["w_pos"], "w_tok": p["w_tok"],
        "emb_ln_g": p["emb_ln_g"], "emb_ln_b": p["emb_ln_b"],
        "head_wd": p["head_wd"].T.astype(bf16),
        "head_bd": p["head_bd"],
        "head_wp": p["head_wp"].astype(bf16),           # [1, H] row
        "head_bp": p["head_bp"],
        "layers": [],
    }
    for lyr in p["layers"]:
        # torch Linear weight is [out, in]; kernel uses x @ W.T.
        wq = lyr["wq"].T * scale                        # fold 1/sqrt(hd) into Q
        wqkv = jnp.concatenate([wq, lyr["wk"].T, lyr["wv"].T], axis=1).astype(bf16)
        bqkv = jnp.concatenate([lyr["bq"] * scale, lyr["bk"], lyr["bv"]],
                               axis=1).astype(jnp.float32)
        fp["layers"].append(dict(
            wqkv=wqkv, bqkv=bqkv,
            wo=lyr["wo"].T.astype(bf16), bo=lyr["bo"],
            ln1_g=lyr["ln1_g"], ln1_b=lyr["ln1_b"],
            w1=lyr["w1"].T.astype(bf16), b1=lyr["b1"],
            w2=lyr["w2"].T.astype(bf16), b2=lyr["b2"],
            ln2_g=lyr["ln2_g"], ln2_b=lyr["ln2_b"],
        ))
    return fp


# ----------------------------- main ----------------------------------------------

if __name__ == "__main__":
    cfg = dict(
        vocab_size=50,
        embedding_size=32,
        hidden_size=32,
        num_heads=4,
        num_hidden_layers=2,
        max_position_embeddings=16,
        type_vocab_size=2,
        dropout_prob=0.1,
        loss_weight=50.0,
    )
    B, S = 2, 8

    key = jax.random.PRNGKey(0)
    k_param, k_ids = jax.random.split(key)
    params = init_params(k_param, cfg)
    prepared = prepare_params(params, cfg)   # one-time weight layout prep

    input_ids = jax.random.randint(k_ids, (B, S), 1, cfg["vocab_size"], dtype=jnp.int32)
    token_type_ids = jnp.zeros((B, S), jnp.int32)
    attention_mask = jnp.ones((B, S), jnp.float32)

    scores = electra_discriminator_forward(prepared, input_ids, token_type_ids,
                                           attention_mask, cfg)
    scores = jax.block_until_ready(scores)
    assert scores.shape == (B, S) and scores.dtype == jnp.float32
    assert bool(jnp.all(jnp.isfinite(scores)))
    print("KERNEL_OK")
</pallas_src>

<mosaic_0001>
module attributes {stable_mosaic.version = 11 : i64} {
  func.func @k(%arg0: i32, %arg1: memref<8x128xf32, #tpu.memory_space<vmem>>, %arg2: memref<8x128xf32, #tpu.memory_space<vmem>>) attributes {dimension_semantics = [#tpu.dimension_semantics<arbitrary>], iteration_bounds = array<i64: 1>, scalar_prefetch = 0 : i64, scratch_operands = 0 : i64, tpu.core_type = #tpu.core_type<tc>, window_params = [{pipeline_mode = #tpu.pipeline_mode<synchronous>, transform_indices = @transform_0, window_bounds = array<i64: 8, 128>}, {pipeline_mode = #tpu.pipeline_mode<synchronous>, transform_indices = @transform_1, window_bounds = array<i64: 8, 128>}]} {
    %c0 = arith.constant 0 : index
    %c0_0 = arith.constant 0 : index
    %0 = vector.load %arg1[%c0, %c0_0] : memref<8x128xf32, #tpu.memory_space<vmem>>, vector<8x128xf32>
    %cst = arith.constant 0.000000e+00 : f32
    %1 = vector.broadcast %cst : f32 to vector<8x128xf32>
    %2 = arith.addf %0, %1 : vector<8x128xf32>
    %c0_1 = arith.constant 0 : index
    %c0_2 = arith.constant 0 : index
    %3 = vector.load %arg2[%c0_1, %c0_2] : memref<8x128xf32, #tpu.memory_space<vmem>>, vector<8x128xf32>
    tpu.vector_store %arg2[%c0_1, %c0_2], %2 {strides = array<i32>} : memref<8x128xf32, #tpu.memory_space<vmem>>, vector<8x128xf32>,
    return
  }
  func.func @transform_0(%arg0: i32) -> (i32, i32) {
    %c0_i32 = arith.constant 0 : i32
    %c0_i32_0 = arith.constant 0 : i32
    %c0_i32_1 = arith.constant 0 : i32
    return %c0_i32, %c0_i32_0 : i32, i32
  }
  func.func @transform_1(%arg0: i32) -> (i32, i32) {
    %c0_i32 = arith.constant 0 : i32
    %c0_i32_0 = arith.constant 0 : i32
    %c0_i32_1 = arith.constant 0 : i32
    return %c0_i32, %c0_i32_0 : i32, i32
  }
}

module attributes {stable_mosaic.version = 11 : i64} {
  func.func @embed_ln_kernel(%arg0: i32, %arg1: memref<16x32xf32, #tpu.memory_space<vmem>>, %arg2: memref<1x32xf32, #tpu.memory_space<vmem>>, %arg3: memref<1x32xf32, #tpu.memory_space<vmem>>, %arg4: memref<16x32xbf16, #tpu.memory_space<vmem>>) attributes {dimension_semantics = [#tpu.dimension_semantics<parallel>], iteration_bounds = array<i64: 1>, scalar_prefetch = 0 : i64, scratch_operands = 0 : i64, tpu.core_type = #tpu.core_type<tc>, window_params = [{transform_indices = @transform_0, window_bounds = array<i64: 16, 32>}, {pipeline_mode = #tpu.pipeline_mode<synchronous>, transform_indices = @transform_1, window_bounds = array<i64: 1, 32>}, {pipeline_mode = #tpu.pipeline_mode<synchronous>, transform_indices = @transform_2, window_bounds = array<i64: 1, 32>}, {transform_indices = @transform_3, window_bounds = array<i64: 16, 32>}]} {
    %c0 = arith.constant 0 : index
    %c0_0 = arith.constant 0 : index
    %0 = vector.load %arg1[%c0, %c0_0] : memref<16x32xf32, #tpu.memory_space<vmem>>, vector<16x32xf32>
    %c0_1 = arith.constant 0 : index
    %c0_2 = arith.constant 0 : index
    %1 = vector.load %arg2[%c0_1, %c0_2] : memref<1x32xf32, #tpu.memory_space<vmem>>, vector<1x32xf32>
    %c0_3 = arith.constant 0 : index
    %c0_4 = arith.constant 0 : index
    %2 = vector.load %arg3[%c0_3, %c0_4] : memref<1x32xf32, #tpu.memory_space<vmem>>, vector<1x32xf32>
    %cst = arith.constant dense<0.000000e+00> : vector<16xf32>
    %3 = vector.multi_reduction <add>, %0, %cst [1] : vector<16x32xf32> to vector<16xf32>
    %4 = vector.shape_cast %3 : vector<16xf32> to vector<16x1xf32>
    %cst_5 = arith.constant 3.200000e+01 : f32
    %5 = vector.broadcast %cst_5 : f32 to vector<16x1xf32>
    %6 = arith.divf %4, %5 : vector<16x1xf32>
    %7 = vector.broadcast %6 : vector<16x1xf32> to vector<16x32xf32>
    %8 = arith.subf %0, %7 : vector<16x32xf32>
    %9 = arith.mulf %8, %8 : vector<16x32xf32>
    %cst_6 = arith.constant dense<0.000000e+00> : vector<16xf32>
    %10 = vector.multi_reduction <add>, %9, %cst_6 [1] : vector<16x32xf32> to vector<16xf32>
    %11 = vector.shape_cast %10 : vector<16xf32> to vector<16x1xf32>
    %cst_7 = arith.constant 3.200000e+01 : f32
    %12 = vector.broadcast %cst_7 : f32 to vector<16x1xf32>
    %13 = arith.divf %11, %12 : vector<16x1xf32>
    %cst_8 = arith.constant 9.99999996E-13 : f32
    %14 = vector.broadcast %cst_8 : f32 to vector<16x1xf32>
    %15 = arith.addf %13, %14 : vector<16x1xf32>
    %16 = math.rsqrt %15 : vector<16x1xf32>
    %17 = vector.broadcast %16 : vector<16x1xf32> to vector<16x32xf32>
    %18 = arith.mulf %8, %17 : vector<16x32xf32>
    %19 = vector.broadcast %1 : vector<1x32xf32> to vector<16x32xf32>
    %20 = arith.mulf %19, %18 : vector<16x32xf32>
    %21 = vector.broadcast %2 : vector<1x32xf32> to vector<16x32xf32>
    %22 = arith.addf %20, %21 : vector<16x32xf32>
    %23 = arith.truncf %22 : vector<16x32xf32> to vector<16x32xbf16>
    %c0_9 = arith.constant 0 : index
    %c0_10 = arith.constant 0 : index
    %24 = vector.load %arg4[%c0_9, %c0_10] : memref<16x32xbf16, #tpu.memory_space<vmem>>, vector<16x32xbf16>
    tpu.vector_store %arg4[%c0_9, %c0_10], %23 {strides = array<i32>} : memref<16x32xbf16, #tpu.memory_space<vmem>>, vector<16x32xbf16>,
    return
  }
  func.func @transform_0(%arg0: i32) -> (i32, i32) {
    %c0_i32 = arith.constant 0 : i32
    %c0_i32_0 = arith.constant 0 : i32
    return %arg0, %c0_i32 : i32, i32
  }
  func.func @transform_1(%arg0: i32) -> (i32, i32) {
    %c0_i32 = arith.constant 0 : i32
    %c0_i32_0 = arith.constant 0 : i32
    %c0_i32_1 = arith.constant 0 : i32
    return %c0_i32, %c0_i32_0 : i32, i32
  }
  func.func @transform_2(%arg0: i32) -> (i32, i32) {
    %c0_i32 = arith.constant 0 : i32
    %c0_i32_0 = arith.constant 0 : i32
    %c0_i32_1 = arith.constant 0 : i32
    return %c0_i32, %c0_i32_0 : i32, i32
  }
  func.func @transform_3(%arg0: i32) -> (i32, i32) {
    %c0_i32 = arith.constant 0 : i32
    %c0_i32_0 = arith.constant 0 : i32
    return %arg0, %c0_i32 : i32, i32
  }
}

</mosaic_0001>

<bundles_post_ra>
// kernel: tpu_custom_call.1
= control target key start
LH: loop header
LB: loop body
LE: loop exit
PB: predicated region body
PF: predicated region fallthrough
CT: control target
= control target key end

     0   :  { %6 = vsyncpa [#allocation3], 0  ;;  %s115_s0 = inlined_call_operand.hbm [shape: f32[8,128], index: 0, kind: input, shape index: {}]   ;;  %s116_s1 = inlined_call_operand.hbm [shape: f32[8,128], index: 1, kind: output, shape index: {}]  }
   0x1   :  { %7 = vsyncpa [#allocation4], 0  ;;  %s13_s8 = sshll.u32 %s115_s0, 4  ;;  %s97_s9 = smov [#allocation2]   ;;  %s14_s8 = int_to_ptr.hbm [resolvable:$true] %s13_s8 }
   0x2   :  { %s15_s10 = sshll.u32 %s97_s9, 4  ;;  %s16_s10 = int_to_ptr.vmem [resolvable:$true] %s15_s10 }
   0x3   :  { %18 = dma.hbm_to_vmem [thread:$0]  %s14_s8, 128, %s16_s10, [#allocation3]  }
   0x4   :  { %93 = dma.done.wait [#allocation3], 128  }
   0x5   :  { %94 = vsyncadd [#allocation3], 4294967168  ;;  %s98_s11 = smov [#allocation5]   ;;  %s33_s15 = sshll.u32 %s116_s1, 4  ;;  %v23_v0 = vld [vmem:[#allocation2] sm:$0xff]  ;;  %s34_s15 = int_to_ptr.hbm [resolvable:$true] %s33_s15 }
   0x6   :  { %s31_s12 = sshll.u32 %s98_s11, 4  ;;  %25 = vst [vmem:[#allocation5] sm:$0xff] %v23_v0  ;;  %s32_s12 = int_to_ptr.vmem [resolvable:$true] %s31_s12 }
   0x7   :  { %36 = dma.vmem_to_hbm [thread:$0]  %s32_s12, 128, %s34_s15, [#allocation4]  }
   0x8   :  { %95 = dma.done.wait [#allocation4], 128  }
   0x9   :  { %96 = vsyncadd [#allocation4], 4294967168 }
   0xa   :  { %41 = vsyncpa [#allocation3], 1 }
   0xb   :  { %42 = vsyncpa [#allocation4], 1 }

// kernel: tpu_custom_call.1
= control target key start
LH: loop header
LB: loop body
LE: loop exit
PB: predicated region body
PF: predicated region fallthrough
CT: control target
= control target key end

     0   :  { %8 = vsyncpa [#allocation3], 0  ;;  %s274_s0 = inlined_call_operand.hbm [shape: f32[16,32], index: 0, kind: input, shape index: {}]   ;;  %s275_s1 = inlined_call_operand.hbm [shape: f32[1,32], index: 1, kind: input, shape index: {}]   ;;  %s276_s2 = inlined_call_operand.vmem [shape: f32[1,32], index: 2, kind: input, shape index: {}]   ;;  %s277_s3 = inlined_call_operand.hbm [shape: bf16[16,32], index: 3, kind: output, shape index: {}]  }
   0x1   :  { %9 = vsyncpa [#allocation6], 0 }
   0x2   :  { %10 = vsyncpa [#allocation4], 0  ;;  %s15_s14 = sshll.u32 %s274_s0, 4  ;;  %s230_s15 = smov [#allocation2]   ;;  %s16_s14 = int_to_ptr.hbm [resolvable:$true] %s15_s14 }
   0x3   :  { %s17_s16 = sshll.u32 %s230_s15, 4  ;;  %s29_s19 = sshll.u32 %s275_s1, 4  ;;  %s18_s16 = int_to_ptr.vmem [resolvable:$true] %s17_s16  ;;  %s30_s19 = int_to_ptr.hbm [resolvable:$true] %s29_s19 }
   0x4   :  { %s231_s20 = smov 128   ;;  %s232_s21 = smov 8  }
   0x5   :  { %23 = dma.hbm_to_vmem [thread:$0]  %s16_s14, 256, %s18_s16, [#allocation3], %s231_s20, %s231_s20, %s232_s21  }
   0x6   :  { %s233_s22 = smov [#allocation5]  }
   0x7   :  { %s31_s23 = sshll.u32 %s233_s22, 4  ;;  %s32_s23 = int_to_ptr.vmem [resolvable:$true] %s31_s23 }
   0x8   :  { %34 = dma.hbm_to_vmem [thread:$0]  %s30_s19, 16, %s32_s23, [#allocation6]  }
   0x9   :  { %224 = dma.done.wait [#allocation3], 256  }
   0xa   :  { %225 = vsyncadd [#allocation3], 4294967040 }
   0xb   :  { %226 = dma.done.wait [#allocation6], 16  }
   0xc   :  { %227 = vsyncadd [#allocation6], 4294967280  ;;  %vm49_vm0 = vcmask 261120   ;;  %v45_v0 = vld [vmem:[#allocation2] sm:$0xff]  ;;  %v46_v2 = vld [vmem:[#allocation2 + $0x8] sm:$0xff]  ;;  %v234_v4 = vmov 32.0  }
   0xd   :  { %v50_v1 = vsel %vm49_vm0, %v45_v0, 0.0  ;;  %v53_v3 = vsel %vm49_vm0, %v46_v2, 0.0  ;;  %146 = vrcp.f32 %v234_v4  ;;  %v144_v35 = vld [vmem:[#allocation5] ss:$0 sm:$0xff]  ;;  %v145_v38 = vld [vmem:[%s276_s2] ss:$0 sm:$0xff] }
   0xe   :  { %51 = vadd.xlane.f32.xlu0 %v50_v1  ;;  %vm113_vm7 = vcmask 257024   ;;  %s235_s24 = smov [#allocation7]   ;;  %s122_s2 = sshll.u32 %s277_s3, 4  ;;  %s123_s2 = int_to_ptr.hbm [resolvable:$true] %s122_s2 }
   0xf   :  { %s120_s25 = sshll.u32 %s235_s24, 4  ;;  %s236_s28 = smov 64   ;;  %s121_s25 = int_to_ptr.vmem [resolvable:$true] %s120_s25 }
  0x10   :  { %s237_s29 = smov 4  }
  0x13   :  { %v147_v5 = vpop.eup %146 }
  0x14   :  { %v57_v6 = vmul.f32 32.0, %v147_v5  ;;  %vm61_vm1 = vweird.f32 %v147_v5 }
  0x16   :  { %54 = vadd.xlane.f32.xlu0 %v53_v3  ;;  %v58_v7 = vsub.f32 1.0, %v57_v6 }
  0x18   :  { %v59_v8 = vmul.f32 %v147_v5, %v58_v7 }
  0x1a   :  { %v60_v9 = vadd.f32 %v147_v5, %v59_v8 }
  0x1c   :  { %v62_v10 = vsel %vm61_vm1, %v147_v5, %v60_v9 }
  0x81   :  { %v52_v11 = vpop.xlane.xlu0 %51 }
  0x82   :  { %v63_v12 = vmul.f32 %v62_v10, %v52_v11 }
  0x84   :  { %v65_v13 = vsub.f32 %v45_v0, %v63_v12 }
  0x86   :  { %v67_v14 = vmul.f32 %v65_v13, %v65_v13 }
  0x88   :  { %v69_v15 = vsel %vm49_vm0, %v67_v14, 0.0 }
  0x89   :  { %70 = vadd.xlane.f32.xlu1 %v69_v15  ;;  %v55_v16 = vpop.xlane.xlu0 %54 }
  0x8a   :  { %v64_v17 = vmul.f32 %v62_v10, %v55_v16 }
  0x8c   :  { %v66_v18 = vsub.f32 %v46_v2, %v64_v17 }
  0x8e   :  { %v68_v19 = vmul.f32 %v66_v18, %v66_v18 }
  0x90   :  { %v72_v20 = vsel %vm49_vm0, %v68_v19, 0.0 }
  0x91   :  { %73 = vadd.xlane.f32.xlu1 %v72_v20 }
  0xfc   :  { %v71_v21 = vpop.xlane.xlu1 %70 }
  0xfd   :  { %v75_v22 = vmul.f32 %v71_v21, %v62_v10 }
  0xff   :  { %v77_v23 = vadd.f32 1e-12, %v75_v22 }
 0x101   :  { %148 = vrsqrt.f32 %v77_v23  ;;  %vm85_vm3 = vweird.f32 %v77_v23 }
 0x104   :  { %v74_v24 = vpop.xlane.xlu1 %73 }
 0x105   :  { %v76_v25 = vmul.f32 %v74_v24, %v62_v10 }
 0x107   :  { %v149_v26 = vpop.eup %148  ;;  %v78_v27 = vadd.f32 1e-12, %v76_v25 }
 0x108   :  { %v80_v28 = vmul.f32 %v149_v26, %v77_v23  ;;  %vm86_vm2 = vweird.f32 %v149_v26 }
 0x109   :  { %150 = vrsqrt.f32 %v78_v27  ;;  %vm87_vm4 = vmor %vm85_vm3, %vm86_vm2  ;;  %vm95_vm6 = vweird.f32 %v78_v27 }
 0x10a   :  { %v81_v29 = vmul.f32 %v149_v26, %v80_v28 }
 0x10c   :  { %v82_v30 = vmul.f32 0.5, %v81_v29 }
 0x10e   :  { %v83_v31 = vsub.f32 1.5, %v82_v30 }
 0x10f   :  { %v151_v32 = vpop.eup %150 }
 0x110   :  { %v84_v33 = vmul.f32 %v149_v26, %v83_v31  ;;  %v90_v34 = vmul.f32 %v151_v32, %v78_v27  ;;  %vm96_vm5 = vweird.f32 %v151_v32 }
 0x111   :  { %vm97_vm8 = vmor %vm95_vm6, %vm96_vm5 }
 0x112   :  { %v88_v36 = vsel %vm87_vm4, %v149_v26, %v84_v33  ;;  %v91_v37 = vmul.f32 %v151_v32, %v90_v34 }
 0x113   :  { %v99_v39 = vmul.f32 %v88_v36, %v65_v13 }
 0x114   :  { %v92_v40 = vmul.f32 0.5, %v91_v37 }
 0x115   :  { %v104_v41 = vmul.f32 %v144_v35, %v99_v39 }
 0x116   :  { %v93_v42 = vsub.f32 1.5, %v92_v40 }
 0x117   :  { %v109_v43 = vadd.f32 %v145_v38, %v104_v41 }
 0x118   :  { %v94_v44 = vmul.f32 %v151_v32, %v93_v42 }
 0x119   :  { %v111_v45 = vpack.c.bf16 %v109_v43, %v109_v43 }
 0x11a   :  { %v98_v46 = vsel %vm97_vm8, %v151_v32, %v94_v44 }
 0x11b   :  { %v100_v47 = vmul.f32 %v98_v46, %v66_v18  ;;  %114 = vst.msk [vmem:[#allocation7] sm:$0xf] %vm113_vm7, %v111_v45 }
 0x11d   :  { %v105_v48 = vmul.f32 %v144_v35, %v100_v47 }
 0x11f   :  { %v110_v49 = vadd.f32 %v145_v38, %v105_v48 }
 0x121   :  { %v112_v50 = vpack.c.bf16 %v110_v49, %v110_v49 }
 0x123   :  { %115 = vst.msk [vmem:[#allocation7 + $0x4] sm:$0xf] %vm113_vm7, %v112_v50 }
 0x124   :  { %128 = dma.vmem_to_hbm [thread:$0]  %s121_s25, 128, %s123_s2, [#allocation4], %s236_s28, %s236_s28, %s237_s29  }
 0x125   :  { %228 = dma.done.wait [#allocation4], 128  }
 0x126   :  { %229 = vsyncadd [#allocation4], 4294967168 }
 0x127   :  { %133 = vsyncpa [#allocation3], 1 }
 0x128   :  { %134 = vsyncpa [#allocation6], 1 }
 0x129   :  { %135 = vsyncpa [#allocation4], 1 }

</bundles_post_ra>
